<compile_context>
chip_gen: v7x
topology: tpu7x:2x2x1
jax: 0.10.0
libtpu: 0.0.40
codegen_flags: <defaults>
</compile_context>

<pallas_src>
import functools

import jax
import jax.numpy as jnp
from jax import lax
from jax.experimental import pallas as pl
from jax.experimental.pallas import tpu as pltpu

EPS = 1e-5


# ---------------------------------------------------------------- device info / VMEM sizing
def _device_vmem_bytes():
    try:
        return int(pltpu.get_tpu_info().vmem_capacity_bytes)
    except Exception:
        return 64 * 1024 * 1024          # conservative fallback (v7x per-TC VMEM)


def _vmem_limit(nbytes):
    """Working set + headroom, never above physical VMEM minus a safety margin."""
    cap = _device_vmem_bytes() - 4 * 1024 * 1024
    want = int(nbytes) + 8 * 1024 * 1024
    return int(max(16 * 1024 * 1024, min(cap, want)))


# ---------------------------------------------------------------- in-kernel math
def _erf(x):
    # Abramowitz & Stegun 7.1.26.  NOTE: the approx EUP reciprocal limits accuracy to ~1e-3
    # (not the polynomial's 1.5e-7) -- plenty for bf16-MXU-level tolerances.
    a1, a2, a3, a4, a5 = 0.254829592, -0.284496736, 1.421413741, -1.453152027, 1.061405429
    p = 0.3275911
    s = jnp.where(x >= 0.0, 1.0, -1.0)
    ax = jnp.abs(x)
    t = pl.reciprocal(1.0 + p * ax, approx=True)      # divide -> EUP, off the VALU slot
    poly = ((((a5 * t + a4) * t + a3) * t + a2) * t + a1) * t
    return s * (1.0 - poly * jnp.exp(-ax * ax))


def _gelu(x):
    # exact GELU (matches torch.nn.GELU() default, approximate='none')
    return 0.5 * x * (1.0 + _erf(x * 0.7071067811865476))


# ---------------------------------------------------------------- stats kernel (bn1, pass over x)
def _stats_kernel(x_ref, sum_ref, sq_ref):
    """Per-channel sum and sum-of-squares over (N, H, W), accumulated across the grid."""
    @pl.when(pl.program_id(0) == 0)
    def _init():
        sum_ref[...] = jnp.zeros_like(sum_ref)
        sq_ref[...] = jnp.zeros_like(sq_ref)

    _, H, W, C = x_ref.shape
    x = x_ref[...].reshape(H * W, C).astype(jnp.float32)
    sum_ref[...] += jnp.sum(x, axis=0, keepdims=True)
    sq_ref[...] += jnp.sum(x * x, axis=0, keepdims=True)


def _channel_stats(x):
    """Per-channel (mean, biased var) over (N, H, W) via a tiled one-pass Pallas reduction."""
    N, H, W, C = x.shape
    nbytes = 2 * H * W * C * x.dtype.itemsize + 8 * C * 4
    # TODO(synk): on v7x, shard this reduction over both TensorCores (leading parallel axis of
    # size 2 with per-core partial rows summed in the wrapper).
    s, sq = pl.pallas_call(
        _stats_kernel,
        grid=(N,),
        in_specs=[pl.BlockSpec((1, H, W, C), lambda i: (i, 0, 0, 0))],
        out_specs=(pl.BlockSpec((1, C), lambda i: (0, 0)),
                   pl.BlockSpec((1, C), lambda i: (0, 0))),
        out_shape=(jax.ShapeDtypeStruct((1, C), jnp.float32),
                   jax.ShapeDtypeStruct((1, C), jnp.float32)),
        compiler_params=pltpu.CompilerParams(
            dimension_semantics=("arbitrary",),          # outputs accumulate across the grid
            vmem_limit_bytes=_vmem_limit(nbytes),
        ),
    )(x)
    cnt = float(N * H * W)
    mean = s / cnt
    # Single-pass E[x^2]-E[x]^2 can cancel in f32; clamp >= 0 (further mitigation: shifted sums).
    var = jnp.maximum(sq / cnt - mean * mean, 0.0)
    return mean, var


# ---------------------------------------------------------------- stage kernel
def _stage_kernel(*refs, H, W, Cin, Cout, has_residual, emit_stats):
    """One batch tile: y = conv3x3(GELU(x*scale + shift)) [+ residual]
       [+ per-channel sum / sum-sq of y accumulated across the grid for the next BN]."""
    it = iter(refs)
    x_ref, scale_ref, shift_ref, w_ref = next(it), next(it), next(it), next(it)
    res_ref = next(it) if has_residual else None
    o_ref = next(it)
    sum_ref = next(it) if emit_stats else None
    sq_ref = next(it) if emit_stats else None
    pad_ref, acc_ref = next(it), next(it)

    Bt = x_ref.shape[0]
    M = Bt * H * W

    if emit_stats:
        @pl.when(pl.program_id(0) == 0)
        def _init_stats():
            sum_ref[...] = jnp.zeros_like(sum_ref)
            sq_ref[...] = jnp.zeros_like(sq_ref)

    # ---- BN (precomputed per-channel affine) + exact-erf GELU in f32 (VPU/EUP);
    #      cast to bf16 only for the MXU operands.
    x = x_ref[...].astype(jnp.float32)                          # (Bt, H, W, Cin)
    scale = scale_ref[...].reshape(1, 1, 1, Cin)
    shift = shift_ref[...].reshape(1, 1, 1, Cin)
    act = _gelu(x * scale + shift).astype(jnp.bfloat16)

    # ---- zero-padded activation scratch: only the 1-pixel border needs zeroing (the interior is
    # fully overwritten); re-zero every step so any grid partitioning across cores stays correct.
    pad_ref[:, 0:1, :, :] = jnp.zeros((Bt, 1, W + 2, Cin), jnp.bfloat16)
    pad_ref[:, H + 1:H + 2, :, :] = jnp.zeros((Bt, 1, W + 2, Cin), jnp.bfloat16)
    pad_ref[:, 1:H + 1, 0:1, :] = jnp.zeros((Bt, H, 1, Cin), jnp.bfloat16)
    pad_ref[:, 1:H + 1, W + 1:W + 2, :] = jnp.zeros((Bt, H, 1, Cin), jnp.bfloat16)
    pad_ref[:, 1:H + 1, 1:W + 1, :] = act

    # ---- 3x3 conv as 9 accumulating per-tap MXU matmuls (K = Cin) into an f32 VMEM accumulator.
    # No materialized im2col: each tap's slice is loaded right before its matmul, so the load
    # co-issues under the previous tap's vmatmul instead of serializing on the vst slot.
    t = 0
    for dh in range(3):
        for dw in range(3):
            tap = pad_ref[:, dh:dh + H, dw:dw + W, :].reshape(M, Cin)       # bf16
            contrib = jnp.dot(tap, w_ref[t], preferred_element_type=jnp.float32)
            if t == 0:
                acc_ref[...] = contrib          # first tap: init (no zero pass needed)
            else:
                acc_ref[...] += contrib
            t += 1

    y = acc_ref[...].reshape(Bt, H, W, Cout)
    if has_residual:
        y = y + res_ref[...].astype(jnp.float32)                # identity residual
    y_out = y.astype(o_ref.dtype)
    o_ref[...] = y_out

    if emit_stats:
        # Fused per-channel stats of y (what bn2 normalizes), saving a full HBM read of y.
        ys = y_out.astype(jnp.float32).reshape(M, Cout)
        sum_ref[...] += jnp.sum(ys, axis=0, keepdims=True)
        sq_ref[...] += jnp.sum(ys * ys, axis=0, keepdims=True)


# ---------------------------------------------------------------- stage wrapper
def _stage_bytes(Bt, H, W, Cin, Cout, in_item, out_item, res_item):
    b = 2 * Bt * H * W * Cin * in_item            # double-buffered input blocks
    b += 2 * Bt * H * W * Cout * out_item         # double-buffered output blocks
    if res_item:
        b += 2 * Bt * H * W * Cout * res_item     # double-buffered residual blocks
    b += 2 * 9 * Cin * Cout * 2                   # bf16 weights
    b += Bt * (H + 2) * (W + 2) * Cin * 2         # bf16 padded-activation scratch
    b += Bt * H * W * Cout * 4                    # f32 conv accumulator scratch
    b += 8 * max(Cin, Cout) * 4                   # scale/shift/stat rows
    return b


def _pick_batch_tile(N, H, W, bytes_fn, budget):
    """Smallest divisor of N giving >= ~1024 matmul rows within the VMEM budget
    (else the largest that fits)."""
    divisors = [d for d in range(1, N + 1) if N % d == 0]
    fitting = [d for d in divisors if bytes_fn(d) <= budget]
    if not fitting:
        return 1
    for d in fitting:
        if d * H * W >= 1024:
            return d
    return fitting[-1]


def _stage(x, scale, shift, w_taps, residual=None, emit_stats=False, out_dtype=None):
    """One block stage, tiled over batch; Pallas double-buffers HBM<->VMEM per tile."""
    N, H, W, Cin = x.shape
    Cout = w_taps.shape[-1]
    out_dtype = x.dtype if out_dtype is None else out_dtype
    has_res = residual is not None

    bytes_fn = functools.partial(
        _stage_bytes, H=H, W=W, Cin=Cin, Cout=Cout,
        in_item=x.dtype.itemsize,
        out_item=jnp.dtype(out_dtype).itemsize,
        res_item=(residual.dtype.itemsize if has_res else 0))
    budget = max(24 * 1024 * 1024, _device_vmem_bytes() // 2)
    Bt = _pick_batch_tile(N, H, W, bytes_fn, budget)
    grid = (N // Bt,)

    kern = functools.partial(_stage_kernel, H=H, W=W, Cin=Cin, Cout=Cout,
                             has_residual=has_res, emit_stats=emit_stats)

    in_specs = [
        pl.BlockSpec((Bt, H, W, Cin), lambda i: (i, 0, 0, 0)),
        pl.BlockSpec((1, Cin), lambda i: (0, 0)),
        pl.BlockSpec((1, Cin), lambda i: (0, 0)),
        pl.BlockSpec((9, Cin, Cout), lambda i: (0, 0, 0)),
    ]
    args = [x, scale, shift, w_taps]
    if has_res:
        in_specs.append(pl.BlockSpec((Bt, H, W, Cout), lambda i: (i, 0, 0, 0)))
        args.append(residual)

    y_spec = pl.BlockSpec((Bt, H, W, Cout), lambda i: (i, 0, 0, 0))
    y_shape = jax.ShapeDtypeStruct((N, H, W, Cout), out_dtype)
    if emit_stats:
        out_specs = (y_spec,
                     pl.BlockSpec((1, Cout), lambda i: (0, 0)),
                     pl.BlockSpec((1, Cout), lambda i: (0, 0)))
        out_shape = (y_shape,
                     jax.ShapeDtypeStruct((1, Cout), jnp.float32),
                     jax.ShapeDtypeStruct((1, Cout), jnp.float32))
        # Fused stats accumulate across the batch axis -> it is a reduction axis.
        # TODO(synk): on v7x, recover megacore by adding a leading parallel axis of size 2 that
        # emits per-core partial stat rows combined in the wrapper.
        semantics = ("arbitrary",)
    else:
        out_specs = y_spec
        out_shape = y_shape
        semantics = ("parallel",)                 # megacore sharding on v7x

    return pl.pallas_call(
        kern,
        grid=grid,
        in_specs=in_specs,
        out_specs=out_specs,
        out_shape=out_shape,
        scratch_shapes=[
            pltpu.VMEM((Bt, H + 2, W + 2, Cin), jnp.bfloat16),    # zero-padded activation
            pltpu.VMEM((Bt * H * W, Cout), jnp.float32),          # conv accumulator
        ],
        compiler_params=pltpu.CompilerParams(
            dimension_semantics=semantics,
            vmem_limit_bytes=_vmem_limit(bytes_fn(Bt)),
        ),
    )(*args)


# ---------------------------------------------------------------- block wrappers
def _bn_fold(mean, var, gamma, beta):
    rstd = lax.rsqrt(jnp.maximum(var, 0.0) + EPS)
    g = gamma.reshape(1, -1).astype(jnp.float32)
    b = beta.reshape(1, -1).astype(jnp.float32)
    scale = rstd * g
    shift = b - mean * scale
    return scale, shift


def basic_block_nhwc(x, gamma1, beta1, w1, gamma2, beta2, w2):
    """x: (N, H, W, Cin) NHWC; w*: (3, 3, Cin, Cout) HWIO.  Returns NHWC."""
    N, H, W, Cin = x.shape
    Cout = w1.shape[-1]
    assert Cin == Cout, "identity residual requires inplanes == planes (downsample=None)"
    # TODO(synk): stride=1 / downsample=None only; strided conv1 + downsample branch not exercised.

    # Weights: HWIO (3,3,Ci,Co) -> tap-major (9, Ci, Co) bf16 (halves weight DMA; MXU bf16 path).
    w1t = w1.reshape(9, Cin, Cout).astype(jnp.bfloat16)
    w2t = w2.reshape(9, Cout, Cout).astype(jnp.bfloat16)

    # bn1: batch statistics of x (training-mode BN), one-pass Pallas reduction.
    mean1, var1 = _channel_stats(x)
    s1, t1 = _bn_fold(mean1, var1, gamma1, beta1)

    # stage 1: bn1 -> GELU -> conv1.  y is stored bf16 (written once, read once) and its
    # per-channel sum / sum-sq are fused into the same kernel, so bn2 needs no extra pass over y.
    y, ysum, ysq = _stage(x, s1, t1, w1t, residual=None, emit_stats=True,
                          out_dtype=jnp.bfloat16)
    cnt = float(N * H * W)
    mean2 = ysum / cnt
    var2 = jnp.maximum(ysq / cnt - mean2 * mean2, 0.0)   # biased variance, clamp f32 cancellation
    s2, t2 = _bn_fold(mean2, var2, gamma2, beta2)

    # stage 2: bn2 -> GELU -> conv2 -> + identity.
    out = _stage(y, s2, t2, w2t, residual=x, emit_stats=False, out_dtype=x.dtype)
    return out


def basic_block(x_nchw, gamma1, beta1, w1, gamma2, beta2, w2):
    """PyTorch-layout wrapper: (N, Cin, H, W) -> (N, Cout, H, W).
    Prefer basic_block_nhwc to avoid the two boundary transposes."""
    x = jnp.transpose(x_nchw, (0, 2, 3, 1))           # NCHW -> NHWC
    out = basic_block_nhwc(x, gamma1, beta1, w1, gamma2, beta2, w2)
    return jnp.transpose(out, (0, 3, 1, 2))           # NHWC -> NCHW


# ---------------------------------------------------------------- pure-JAX reference
def basic_block_ref(x_nchw, gamma1, beta1, w1, gamma2, beta2, w2):
    x = jnp.transpose(x_nchw, (0, 2, 3, 1)).astype(jnp.float32)

    def bn(v, g, b):
        m = jnp.mean(v, axis=(0, 1, 2), keepdims=True)
        var = jnp.mean((v - m) ** 2, axis=(0, 1, 2), keepdims=True)
        return (v - m) * lax.rsqrt(var + EPS) * g + b

    def conv(v, w):
        return lax.conv_general_dilated(
            v, w, window_strides=(1, 1), padding=((1, 1), (1, 1)),
            dimension_numbers=("NHWC", "HWIO", "NHWC"),
            precision=lax.Precision.HIGHEST)

    out = jax.nn.gelu(bn(x, gamma1, beta1), approximate=False)
    out = conv(out, w1)
    out = jax.nn.gelu(bn(out, gamma2, beta2), approximate=False)
    out = conv(out, w2)
    out = out + x
    return jnp.transpose(out, (0, 3, 1, 2))


# ---------------------------------------------------------------- main
if __name__ == "__main__":
    key = jax.random.PRNGKey(0)
    k_x, k_g1, k_b1, k_w1, k_g2, k_b2, k_w2 = jax.random.split(key, 7)

    N, C, H, W = 2, 4, 16, 16          # inplanes = planes = 4, stride = 1, downsample = None
    fan_in = C * 3 * 3

    x = jax.random.normal(k_x, (N, C, H, W), jnp.float32)

    gamma1 = 1.0 + 0.2 * jax.random.normal(k_g1, (C,), jnp.float32)
    beta1 = 0.1 * jax.random.normal(k_b1, (C,), jnp.float32)
    w1 = jax.random.normal(k_w1, (3, 3, C, C), jnp.float32) * (2.0 / fan_in) ** 0.5
    gamma2 = 1.0 + 0.2 * jax.random.normal(k_g2, (C,), jnp.float32)
    beta2 = 0.1 * jax.random.normal(k_b2, (C,), jnp.float32)
    w2 = jax.random.normal(k_w2, (3, 3, C, C), jnp.float32) * (2.0 / fan_in) ** 0.5

    out = basic_block(x, gamma1, beta1, w1, gamma2, beta2, w2)
    out = jax.block_until_ready(out)

    ref = basic_block_ref(x, gamma1, beta1, w1, gamma2, beta2, w2)
    assert out.shape == (N, C, H, W), out.shape
    max_err = float(jnp.max(jnp.abs(out - ref)))
    # bf16 MXU operands + bf16 intermediate y (f32 accumulation, BN2 re-normalizes) ->
    # tolerance sized for ~8-bit operand mantissas.
    assert jnp.allclose(out, ref, atol=5e-2, rtol=5e-2), max_err

    print("KERNEL_OK")
</pallas_src>

<mosaic_0001>
module attributes {stable_mosaic.version = 11 : i64} {
  func.func @_stats_kernel(%arg0: i32, %arg1: memref<1x16x16x4xf32, #tpu.memory_space<vmem>>, %arg2: memref<1x4xf32, #tpu.memory_space<vmem>>, %arg3: memref<1x4xf32, #tpu.memory_space<vmem>>) attributes {dimension_semantics = [#tpu.dimension_semantics<arbitrary>], iteration_bounds = array<i64: 2>, scalar_prefetch = 0 : i64, scratch_operands = 0 : i64, tpu.core_type = #tpu.core_type<tc>, window_params = [{transform_indices = @transform_0, window_bounds = array<i64: 1, 16, 16, 4>}, {pipeline_mode = #tpu.pipeline_mode<synchronous>, transform_indices = @transform_1, window_bounds = array<i64: 1, 4>}, {pipeline_mode = #tpu.pipeline_mode<synchronous>, transform_indices = @transform_2, window_bounds = array<i64: 1, 4>}]} {
    %c0_i32 = arith.constant 0 : i32
    %0 = arith.cmpi eq, %arg0, %c0_i32 : i32
    %1 = arith.extui %0 : i1 to i32
    %c0_i32_0 = arith.constant 0 : i32
    %2 = arith.cmpi ne, %1, %c0_i32_0 : i32
    scf.if %2 {
      %cst_13 = arith.constant 0.000000e+00 : f32
      %16 = vector.broadcast %cst_13 : f32 to vector<1x4xf32>
      %c0_14 = arith.constant 0 : index
      %c0_15 = arith.constant 0 : index
      %17 = vector.load %arg2[%c0_14, %c0_15] : memref<1x4xf32, #tpu.memory_space<vmem>>, vector<1x4xf32>
      tpu.vector_store %arg2[%c0_14, %c0_15], %16 {strides = array<i32>} : memref<1x4xf32, #tpu.memory_space<vmem>>, vector<1x4xf32>,
      %cst_16 = arith.constant 0.000000e+00 : f32
      %18 = vector.broadcast %cst_16 : f32 to vector<1x4xf32>
      %c0_17 = arith.constant 0 : index
      %c0_18 = arith.constant 0 : index
      %19 = vector.load %arg3[%c0_17, %c0_18] : memref<1x4xf32, #tpu.memory_space<vmem>>, vector<1x4xf32>
      tpu.vector_store %arg3[%c0_17, %c0_18], %18 {strides = array<i32>} : memref<1x4xf32, #tpu.memory_space<vmem>>, vector<1x4xf32>,
    } else {
    }
    %c0 = arith.constant 0 : index
    %c0_1 = arith.constant 0 : index
    %c0_2 = arith.constant 0 : index
    %c0_3 = arith.constant 0 : index
    %3 = vector.load %arg1[%c0, %c0_1, %c0_2, %c0_3] : memref<1x16x16x4xf32, #tpu.memory_space<vmem>>, vector<1x16x16x4xf32>
    %4 = vector.shape_cast %3 : vector<1x16x16x4xf32> to vector<256x4xf32>
    %c0_4 = arith.constant 0 : index
    %c0_5 = arith.constant 0 : index
    %5 = vector.load %arg2[%c0_4, %c0_5] : memref<1x4xf32, #tpu.memory_space<vmem>>, vector<1x4xf32>
    %cst = arith.constant dense<0.000000e+00> : vector<4xf32>
    %6 = vector.multi_reduction <add>, %4, %cst [0] : vector<256x4xf32> to vector<4xf32>
    %7 = vector.shape_cast %6 : vector<4xf32> to vector<1x4xf32>
    %8 = arith.addf %5, %7 : vector<1x4xf32>
    %c0_6 = arith.constant 0 : index
    %c0_7 = arith.constant 0 : index
    %9 = vector.load %arg2[%c0_6, %c0_7] : memref<1x4xf32, #tpu.memory_space<vmem>>, vector<1x4xf32>
    tpu.vector_store %arg2[%c0_6, %c0_7], %8 {strides = array<i32>} : memref<1x4xf32, #tpu.memory_space<vmem>>, vector<1x4xf32>,
    %c0_8 = arith.constant 0 : index
    %c0_9 = arith.constant 0 : index
    %10 = vector.load %arg3[%c0_8, %c0_9] : memref<1x4xf32, #tpu.memory_space<vmem>>, vector<1x4xf32>
    %11 = arith.mulf %4, %4 : vector<256x4xf32>
    %cst_10 = arith.constant dense<0.000000e+00> : vector<4xf32>
    %12 = vector.multi_reduction <add>, %11, %cst_10 [0] : vector<256x4xf32> to vector<4xf32>
    %13 = vector.shape_cast %12 : vector<4xf32> to vector<1x4xf32>
    %14 = arith.addf %10, %13 : vector<1x4xf32>
    %c0_11 = arith.constant 0 : index
    %c0_12 = arith.constant 0 : index
    %15 = vector.load %arg3[%c0_11, %c0_12] : memref<1x4xf32, #tpu.memory_space<vmem>>, vector<1x4xf32>
    tpu.vector_store %arg3[%c0_11, %c0_12], %14 {strides = array<i32>} : memref<1x4xf32, #tpu.memory_space<vmem>>, vector<1x4xf32>,
    return
  }
  func.func @transform_0(%arg0: i32) -> (i32, i32, i32, i32) {
    %c0_i32 = arith.constant 0 : i32
    %c0_i32_0 = arith.constant 0 : i32
    %c0_i32_1 = arith.constant 0 : i32
    %c0_i32_2 = arith.constant 0 : i32
    return %arg0, %c0_i32, %c0_i32_0, %c0_i32_1 : i32, i32, i32, i32
  }
  func.func @transform_1(%arg0: i32) -> (i32, i32) {
    %c0_i32 = arith.constant 0 : i32
    %c0_i32_0 = arith.constant 0 : i32
    %c0_i32_1 = arith.constant 0 : i32
    return %c0_i32, %c0_i32_0 : i32, i32
  }
  func.func @transform_2(%arg0: i32) -> (i32, i32) {
    %c0_i32 = arith.constant 0 : i32
    %c0_i32_0 = arith.constant 0 : i32
    %c0_i32_1 = arith.constant 0 : i32
    return %c0_i32, %c0_i32_0 : i32, i32
  }
}

</mosaic_0001>

<bundles_post_ra>
// kernel: tpu_custom_call.1
= control target key start
LH: loop header
LB: loop body
LE: loop exit
PB: predicated region body
PF: predicated region fallthrough
CT: control target
= control target key end

     0   :  { %8 = vsyncpa [#allocation3], 0  ;;  %s701_s0 = inlined_call_operand.vmem [shape: f32[2,16,16,4], index: 0, kind: input, shape index: {}]   ;;  %s702_s1 = inlined_call_operand.hbm [shape: f32[1,4], index: 1, kind: output, shape index: {0}]   ;;  %s703_s2 = inlined_call_operand.hbm [shape: f32[1,4], index: 2, kind: output, shape index: {1}]  }
   0x1   :  { %9 = vsyncpa [#allocation5], 0  ;;  %s537_s9 = smov 0  }
   0x2 LB: > { %s543_s10 = sadd.s32 4294967295, %s517_s9   ;;  %p417_p0 = scmp.ge.s32.totalorder %s517_s9, 1  ;;  %s517_s9 = sphi %s537_s9, %s15_s9  }
   0x3   : > { %p107_p1 = scmp.lt.s32.totalorder %s517_s9, 3 }
   0x5   : > { %p108_p2 = pnand %p417_p0, %p107_p1 }
   0x6   : > { %p124_p3 = scmp.lt.s32.totalorder (!%p108_p2), %s543_s10, 1  ;;  %p420_p4 = scmp.ne.s32.totalorder (!%p108_p2), %s543_s10, 0 }
   0x7   : > { %111 = sbr.rel (%p108_p2) target bundleno = 145 (0x91), region = 24 }
   0xe   : > { %s125_s11 = scalar_select %p124_p3, %s543_s10, 1 }
   0xf   : > { %132 = sbr.rel (%p420_p4) target bundleno = 22 (0x16), region = 28  ;;  %vm133_vm0 = vcmask (!%p420_p4), 24576   ;;  %v519_v0 = vmov (!%p420_p4), 0.0  }
  0x10   : > { %s427_s12 = sshll.u32 %s125_s11, 8  ;;  %134 = vst.msk [vmem:[#allocation2] sm:$0x1] (!%p420_p4), %vm133_vm0, %v519_v0  ;;  %135 = vst.msk [vmem:[#allocation4] sm:$0x1] (!%p420_p4), %vm133_vm0, %v519_v0 }
  0x11   : > { %s552_s15 = scalar_lea.vmem %s701_s0, %s427_s12 }
  0x16 PF: > { %v136_v1 = vld [vmem:[%s552_s15] sm:$0xff]  ;;  %v137_v2 = vld [vmem:[%s552_s15 + $0x8] sm:$0xff]  ;;  %v138_v3 = vld [vmem:[%s552_s15 + $0x10] sm:$0xff]  ;;  %vm169_vm1 = vcmask 31744   ;;  %s520_s16 = smov [#allocation2]   ;;  %vm240_vm2 = vcmask 24576  }
  0x17   : > { %v170_v4 = vsel %vm169_vm1, %v136_v1, 0.0  ;;  %v171_v5 = vsel %vm169_vm1, %v137_v2, 0.0  ;;  %v173_v6 = vsel %vm169_vm1, %v138_v3, 0.0  ;;  %v139_v7 = vld [vmem:[%s552_s15 + $0x18] sm:$0xff]  ;;  %v140_v10 = vld [vmem:[%s552_s15 + $0x20] sm:$0xff]  ;;  %v141_v13 = vld [vmem:[%s552_s15 + $0x28] sm:$0xff]  ;;  %v243_v28 = vmul.f32 %v136_v1, %v136_v1 }
  0x18   : > { %v172_v8 = vadd.f32 %v171_v5, %v170_v4  ;;  %v175_v9 = vsel %vm169_vm1, %v139_v7, 0.0  ;;  %v177_v12 = vsel %vm169_vm1, %v140_v10, 0.0  ;;  %v179_v15 = vsel %vm169_vm1, %v141_v13, 0.0  ;;  %v142_v16 = vld [vmem:[%s552_s15 + $0x30] sm:$0xff]  ;;  %v143_v19 = vld [vmem:[%s552_s15 + $0x38] sm:$0xff]  ;;  %v144_v22 = vld [vmem:[%s552_s15 + $0x40] sm:$0xff] }
  0x19   : > { %v181_v18 = vsel %vm169_vm1, %v142_v16, 0.0  ;;  %v183_v21 = vsel %vm169_vm1, %v143_v19, 0.0  ;;  %v185_v24 = vsel %vm169_vm1, %v144_v22, 0.0  ;;  %v145_v25 = vld [vmem:[%s552_s15 + $0x48] sm:$0xff]  ;;  %v244_v29 = vmul.f32 %v137_v2, %v137_v2  ;;  %v146_v31 = vld [vmem:[%s552_s15 + $0x50] sm:$0xff]  ;;  %v147_v33 = vld [vmem:[%s552_s15 + $0x58] sm:$0xff] }
  0x1a   : > { %v174_v11 = vadd.f32 %v173_v6, %v172_v8  ;;  %v187_v27 = vsel %vm169_vm1, %v145_v25, 0.0  ;;  %v245_v30 = vmul.f32 %v138_v3, %v138_v3  ;;  %v189_v34 = vsel %vm169_vm1, %v146_v31, 0.0  ;;  %v148_v42 = vld [vmem:[%s552_s15 + $0x60] sm:$0xff]  ;;  %v149_v48 = vld [vmem:[%s552_s15 + $0x68] sm:$0xff]  ;;  %v150_v54 = vld [vmem:[%s552_s15 + $0x70] sm:$0xff]  ;;  %s353_s17 = sshll.u32 %s520_s16, 4  ;;  %s354_s17 = int_to_ptr.vmem [resolvable:$true] %s353_s17 }
  0x1b   : > { %v246_v35 = vmul.f32 %v139_v7, %v139_v7  ;;  %v191_v37 = vsel %vm169_vm1, %v147_v33, 0.0  ;;  %v247_v38 = vmul.f32 %v140_v10, %v140_v10  ;;  %v275_v39 = vsel %vm169_vm1, %v243_v28, 0.0  ;;  %v151_v60 = vld [vmem:[%s552_s15 + $0x78] sm:$0xff]  ;;  %v152_v2 = vld [vmem:[%s552_s15 + $0x80] sm:$0xff]  ;;  %v153_v8 = vld [vmem:[%s552_s15 + $0x88] sm:$0xff]  ;;  %p436_p5 = scmp.eq.s32.totalorder %s543_s10, 1  ;;  %p458_p9 = scmp.lt.s32.totalorder %s354_s17, %s354_s17 }
  0x1c   : > { %v176_v14 = vadd.f32 %v175_v9, %v174_v11  ;;  %v276_v40 = vsel %vm169_vm1, %v244_v29, 0.0  ;;  %v278_v41 = vsel %vm169_vm1, %v245_v30, 0.0  ;;  %v193_v45 = vsel %vm169_vm1, %v148_v42, 0.0  ;;  %s451_s18 = scalar_lea.vmem %s354_s17, 16  ;;  %s457_s19 = scalar_lea.vmem %s354_s17, 32 }
  0x1d   : > { %v277_v44 = vadd.f32 %v276_v40, %v275_v39  ;;  %v248_v46 = vmul.f32 %v141_v13, %v141_v13  ;;  %v280_v47 = vsel %vm169_vm1, %v246_v35, 0.0  ;;  %v195_v51 = vsel %vm169_vm1, %v149_v48, 0.0  ;;  %p452_p6 = scmp.ne.s32.totalorder %s354_s17, %s451_s18  ;;  %p459_p10 = scmp.lt.s32.totalorder %s457_s19, %s451_s18 }
  0x1e   : > { %v178_v17 = vadd.f32 %v177_v12, %v176_v14  ;;  %v249_v52 = vmul.f32 %v142_v16, %v142_v16  ;;  %v282_v53 = vsel %vm169_vm1, %v247_v38, 0.0  ;;  %v197_v57 = vsel %vm169_vm1, %v150_v54, 0.0  ;;  %v154_v14 = vld [vmem:[%s552_s15 + $0x90] sm:$0xff] }
  0x1f   : > { %v279_v50 = vadd.f32 %v278_v41, %v277_v44  ;;  %v250_v58 = vmul.f32 %v143_v19, %v143_v19  ;;  %v284_v59 = vsel %vm169_vm1, %v248_v46, 0.0  ;;  %v199_v63 = vsel %vm169_vm1, %v151_v60, 0.0  ;;  %v158_v38 = vld [vmem:[%s552_s15 + $0xb0] sm:$0xff]  ;;  %v159_v44 = vld [vmem:[%s552_s15 + $0xb8] sm:$0xff]  ;;  %p453_p7 = pnand %p452_p6, %p436_p5  ;;  %p460_p11 = por %p459_p10, %p458_p9 }
  0x20   : > { %v180_v20 = vadd.f32 %v179_v15, %v178_v17  ;;  %v251_v0 = vmul.f32 %v144_v22, %v144_v22  ;;  %v286_v1 = vsel %vm169_vm1, %v249_v52, 0.0  ;;  %v201_v5 = vsel %vm169_vm1, %v152_v2, 0.0 }
  0x21   : > { %v281_v56 = vadd.f32 %v280_v47, %v279_v50  ;;  %v252_v6 = vmul.f32 %v145_v25, %v145_v25  ;;  %v288_v7 = vsel %vm169_vm1, %v250_v58, 0.0  ;;  %v203_v11 = vsel %vm169_vm1, %v153_v8, 0.0  ;;  %v160_v50 = vld [vmem:[%s552_s15 + $0xc0] sm:$0xff]  ;;  %p454_p8 = pneg %p453_p7 }
  0x22   : > { %v182_v23 = vadd.f32 %v181_v18, %v180_v20  ;;  %v253_v12 = vmul.f32 %v146_v31, %v146_v31  ;;  %v290_v13 = vsel %vm169_vm1, %v251_v0, 0.0  ;;  %v205_v17 = vsel %vm169_vm1, %v154_v14, 0.0  ;;  %v155_v20 = vld [vmem:[%s552_s15 + $0x98] sm:$0xff] }
  0x23   : > { %v283_v62 = vadd.f32 %v282_v53, %v281_v56  ;;  %v254_v18 = vmul.f32 %v147_v33, %v147_v33  ;;  %v292_v19 = vsel %vm169_vm1, %v252_v6, 0.0  ;;  %v256_v30 = vmul.f32 %v149_v48, %v149_v48  ;;  %v161_v56 = vld [vmem:[%s552_s15 + $0xc8] sm:$0xff]  ;;  %p461_p12 = pnand %p460_p11, %p454_p8 }
  0x24   : > { %v184_v26 = vadd.f32 %v183_v21, %v182_v23  ;;  %v207_v23 = vsel %vm169_vm1, %v155_v20, 0.0  ;;  %v294_v25 = vsel %vm169_vm1, %v253_v12, 0.0  ;;  %v213_v41 = vsel %vm169_vm1, %v158_v38, 0.0 }
  0x25   : > { %v285_v4 = vadd.f32 %v284_v59, %v283_v62  ;;  %v296_v31 = vsel %vm169_vm1, %v254_v18, 0.0  ;;  %v215_v47 = vsel %vm169_vm1, %v159_v44, 0.0  ;;  %v259_v48 = vmul.f32 %v152_v2, %v152_v2  ;;  %v162_v62 = vld [vmem:[%s552_s15 + $0xd0] sm:$0xff] }
  0x26   : > { %v186_v32 = vadd.f32 %v185_v24, %v184_v26  ;;  %v255_v24 = vmul.f32 %v148_v42, %v148_v42  ;;  %v156_v26 = vld [vmem:[%s552_s15 + $0xa0] sm:$0xff]  ;;  %v258_v42 = vmul.f32 %v151_v60, %v151_v60  ;;  %v217_v53 = vsel %vm169_vm1, %v160_v50, 0.0 }
  0x27   : > { %v287_v10 = vadd.f32 %v286_v1, %v285_v4  ;;  %v209_v29 = vsel %vm169_vm1, %v156_v26, 0.0  ;;  %v219_v59 = vsel %vm169_vm1, %v161_v56, 0.0  ;;  %v261_v60 = vmul.f32 %v154_v14, %v154_v14  ;;  %v163_v4 = vld [vmem:[%s552_s15 + $0xd8] sm:$0xff] }
  0x28   : > { %v188_v36 = vadd.f32 %v187_v27, %v186_v32  ;;  %v157_v32 = vld [vmem:[%s552_s15 + $0xa8] sm:$0xff]  ;;  %v221_v1 = vsel %vm169_vm1, %v162_v62, 0.0  ;;  %v262_v2 = vmul.f32 %v155_v20, %v155_v20  ;;  %v265_v20 = vmul.f32 %v158_v38, %v158_v38 }
  0x29   : > { %v289_v16 = vadd.f32 %v288_v7, %v287_v10  ;;  %v211_v35 = vsel %vm169_vm1, %v157_v32, 0.0  ;;  %v223_v7 = vsel %vm169_vm1, %v163_v4, 0.0  ;;  %v164_v10 = vld [vmem:[%s552_s15 + $0xe0] sm:$0xff]  ;;  %v264_v14 = vmul.f32 %v157_v32, %v157_v32 }
  0x2a   : > { %v190_v43 = vadd.f32 %v189_v34, %v188_v36  ;;  %v257_v36 = vmul.f32 %v150_v54, %v150_v54  ;;  %v260_v54 = vmul.f32 %v153_v8, %v153_v8  ;;  %v263_v8 = vmul.f32 %v156_v26, %v156_v26 }
  0x2b   : > { %v291_v22 = vadd.f32 %v290_v13, %v289_v16  ;;  %v225_v13 = vsel %vm169_vm1, %v164_v10, 0.0  ;;  %v165_v16 = vld [vmem:[%s552_s15 + $0xe8] sm:$0xff]  ;;  %v266_v26 = vmul.f32 %v159_v44, %v159_v44  ;;  %v267_v32 = vmul.f32 %v160_v50, %v160_v50 }
  0x2c   : > { %v192_v49 = vadd.f32 %v191_v37, %v190_v43  ;;  %v298_v37 = vsel %vm169_vm1, %v255_v24, 0.0  ;;  %v300_v43 = vsel %vm169_vm1, %v256_v30, 0.0  ;;  %v270_v44 = vmul.f32 %v163_v4, %v163_v4 }
  0x2d   : > { %v293_v28 = vadd.f32 %v292_v19, %v291_v22  ;;  %v227_v19 = vsel %vm169_vm1, %v165_v16, 0.0  ;;  %v166_v22 = vld [vmem:[%s552_s15 + $0xf0] sm:$0xff] }
  0x2e   : > { %v194_v55 = vadd.f32 %v193_v45, %v192_v49  ;;  %v302_v49 = vsel %vm169_vm1, %v257_v36, 0.0  ;;  %v268_v36 = vmul.f32 %v161_v56, %v161_v56  ;;  %v273_v56 = vmul.f32 %v166_v22, %v166_v22 }
  0x2f   : > { %v295_v34 = vadd.f32 %v294_v25, %v293_v28  ;;  %v229_v25 = vsel %vm169_vm1, %v166_v22, 0.0  ;;  %v167_v28 = vld [vmem:[%s552_s15 + $0xf8] sm:$0xff] }
  0x30   : > { %v196_v61 = vadd.f32 %v195_v51, %v194_v55  ;;  %v304_v55 = vsel %vm169_vm1, %v258_v42, 0.0 }
  0x31   : > { %v297_v40 = vadd.f32 %v296_v31, %v295_v34  ;;  %v231_v31 = vsel %vm169_vm1, %v167_v28, 0.0 }
  0x32   : > { %v198_v3 = vadd.f32 %v197_v57, %v196_v61  ;;  %v306_v61 = vsel %vm169_vm1, %v259_v48, 0.0  ;;  %v271_v48 = vmul.f32 %v164_v10, %v164_v10 }
  0x33   : > { %v299_v46 = vadd.f32 %v298_v37, %v297_v40  ;;  %v320_v37 = vsel %vm169_vm1, %v266_v26, 0.0  ;;  %v269_v40 = vmul.f32 %v162_v62, %v162_v62 }
  0x34   : > { %v200_v9 = vadd.f32 %v199_v63, %v198_v3  ;;  %v308_v3 = vsel %vm169_vm1, %v260_v54, 0.0 }
  0x35   : > { %v301_v52 = vadd.f32 %v300_v43, %v299_v46 }
  0x36   : > { %v202_v15 = vadd.f32 %v201_v5, %v200_v9  ;;  %v310_v9 = vsel %vm169_vm1, %v261_v60, 0.0  ;;  %v168_v60 = vld [vmem:[#allocation2] sm:$0x1] }
  0x37   : > { %v303_v58 = vadd.f32 %v302_v49, %v301_v52  ;;  %v326_v49 = vsel %vm169_vm1, %v269_v40, 0.0  ;;  %v272_v52 = vmul.f32 %v165_v16, %v165_v16 }
  0x38   : > { %v204_v21 = vadd.f32 %v203_v11, %v202_v15  ;;  %v312_v15 = vsel %vm169_vm1, %v262_v2, 0.0 }
  0x39   : > { %v305_v0 = vadd.f32 %v304_v55, %v303_v58  ;;  %v332_v62 = vsel %vm169_vm1, %v272_v52, 0.0 }
  0x3a   : > { %v206_v27 = vadd.f32 %v205_v17, %v204_v21  ;;  %v314_v21 = vsel %vm169_vm1, %v263_v8, 0.0 }
  0x3b   : > { %v307_v6 = vadd.f32 %v306_v61, %v305_v0  ;;  %v274_v61 = vmul.f32 %v167_v28, %v167_v28 }
  0x3c   : > { %v208_v33 = vadd.f32 %v207_v23, %v206_v27  ;;  %v316_v27 = vsel %vm169_vm1, %v264_v14, 0.0 }
  0x3d   : > { %v309_v12 = vadd.f32 %v308_v3, %v307_v6  ;;  %v336_v4 = vsel %vm169_vm1, %v274_v61, 0.0 }
  0x3e   : > { %v210_v39 = vadd.f32 %v209_v29, %v208_v33  ;;  %v318_v33 = vsel %vm169_vm1, %v265_v20, 0.0 }
  0x3f   : > { %v311_v18 = vadd.f32 %v310_v9, %v309_v12 }
  0x40   : > { %v212_v45 = vadd.f32 %v211_v35, %v210_v39 }
  0x41   : > { %v313_v24 = vadd.f32 %v312_v15, %v311_v18 }
  0x42   : > { %v214_v51 = vadd.f32 %v213_v41, %v212_v45  ;;  %v322_v41 = vsel %vm169_vm1, %v267_v32, 0.0  ;;  %v324_v45 = vsel %vm169_vm1, %v268_v36, 0.0 }
  0x43   : > { %v315_v30 = vadd.f32 %v314_v21, %v313_v24 }
  0x44   : > { %v216_v57 = vadd.f32 %v215_v47, %v214_v51 }
  0x45   : > { %v317_v35 = vadd.f32 %v316_v27, %v315_v30 }
  0x46   : > { %v218_v63 = vadd.f32 %v217_v53, %v216_v57  ;;  %v328_v53 = vsel %vm169_vm1, %v270_v44, 0.0  ;;  %v330_v57 = vsel %vm169_vm1, %v271_v48, 0.0 }
  0x47   : > { %v319_v39 = vadd.f32 %v318_v33, %v317_v35 }
  0x48   : > { %v220_v5 = vadd.f32 %v219_v59, %v218_v63 }
  0x49   : > { %v321_v43 = vadd.f32 %v320_v37, %v319_v39 }
  0x4a   : > { %v222_v11 = vadd.f32 %v221_v1, %v220_v5  ;;  %v334_v1 = vsel %vm169_vm1, %v273_v56, 0.0 }
  0x4b   : > { %v323_v47 = vadd.f32 %v322_v41, %v321_v43 }
  0x4c   : > { %v224_v17 = vadd.f32 %v223_v7, %v222_v11 }
  0x4d   : > { %v325_v51 = vadd.f32 %v324_v45, %v323_v47 }
  0x4e   : > { %v226_v23 = vadd.f32 %v225_v13, %v224_v17 }
  0x4f   : > { %v327_v55 = vadd.f32 %v326_v49, %v325_v51 }
  0x50   : > { %v228_v29 = vadd.f32 %v227_v19, %v226_v23 }
  0x51   : > { %v329_v59 = vadd.f32 %v328_v53, %v327_v55 }
  0x52   : > { %v230_v34 = vadd.f32 %v229_v25, %v228_v29 }
  0x53   : > { %v331_v0 = vadd.f32 %v330_v57, %v329_v59 }
  0x54   : > { %v232_v38 = vadd.f32 %v231_v31, %v230_v34 }
  0x55   : > { %v333_v3 = vadd.f32 %v332_v62, %v331_v0 }
  0x56   : > { %v233_v42 = vrot.slane %v232_v38, 4 }
  0x57   : > { %v335_v5 = vadd.f32 %v334_v1, %v333_v3 }
  0x58   : > { %v234_v46 = vadd.f32 %v233_v42, %v232_v38 }
  0x5a   : > { %v235_v50 = vrot.slane %v234_v46, 2 }
  0x5c   : > { %v236_v54 = vadd.f32 %v235_v50, %v234_v46 }
  0x5e   : > { %v237_v58 = vrot.slane %v236_v54, 1 }
  0x60   : > { %v238_v63 = vadd.f32 %v237_v58, %v236_v54 }
  0x62   : > { %v239_v2 = vadd.f32 %v238_v63, %v168_v60 }
  0x64   : > { %241 = vst.msk [vmem:[#allocation2] sm:$0x1] %vm240_vm2, %v239_v2 }
  0x65   : > { %464 = shalt.err (!%p461_p12)
}
  0x66   : > { %s465_s22 = scalar_lea.hbm %s702_s1, 16 }
  0x67   : > { %p466_p13 = scmp.ne.s32.totalorder %s702_s1, %s465_s22  ;;  %p471_p2 = scmp.lt.u32.totalorder %s465_s22, %s702_s1 }
  0x69   : > { %p467_p0 = pnand %p466_p13, %p436_p5 }
  0x6b   : > { %p468_p1 = pneg %p467_p0 }
  0x6d   : > { %p473_p3 = pnand %p471_p2, %p468_p1 }
  0x6f   : > { %476 = shalt.err (!%p473_p3)
}
  0x70   : > { %429 = dma.vmem_to_hbm [thread:$0]  (%p436_p5), %s354_s17, 16, %s702_s1, [#allocation3]   ;;  %v337_v6 = vadd.f32 %v336_v4, %v335_v5  ;;  %v242_v12 = vld [vmem:[#allocation4] sm:$0x1] }
  0x71   : > { %s521_s29 = smov [#allocation4]  }
  0x72   : > { %v338_v7 = vrot.slane %v337_v6, 4  ;;  %s364_s30 = sshll.u32 %s521_s29, 4  ;;  %s365_s30 = int_to_ptr.vmem [resolvable:$true] %s364_s30 }
  0x73   : > { %s477_s3 = scalar_lea.vmem %s365_s30, 16  ;;  %s483_s4 = scalar_lea.vmem %s365_s30, 32 }
  0x74   : > { %v339_v8 = vadd.f32 %v338_v7, %v337_v6  ;;  %p478_p4 = scmp.ne.s32.totalorder %s365_s30, %s477_s3  ;;  %p484_p8 = scmp.lt.s32.totalorder %s365_s30, %s365_s30 }
  0x75   : > { %p485_p9 = scmp.lt.s32.totalorder %s483_s4, %s477_s3 }
  0x76   : > { %v340_v9 = vrot.slane %v339_v8, 2  ;;  %p479_p6 = pnand %p478_p4, %p436_p5 }
  0x77   : > { %p486_p10 = por %p485_p9, %p484_p8 }
  0x78   : > { %v341_v10 = vadd.f32 %v340_v9, %v339_v8  ;;  %p480_p7 = pneg %p479_p6 }
  0x7a   : > { %v342_v11 = vrot.slane %v341_v10, 1  ;;  %p487_p11 = pnand %p486_p10, %p480_p7 }
  0x7c   : > { %v343_v13 = vadd.f32 %v342_v11, %v341_v10 }
  0x7e   : > { %v344_v14 = vadd.f32 %v343_v13, %v242_v12 }
  0x80   : > { %345 = vst.msk [vmem:[#allocation4] sm:$0x1] %vm240_vm2, %v344_v14 }
  0x81   : > { %490 = shalt.err (!%p487_p11)
}
  0x82   : > { %s491_s7 = scalar_lea.hbm %s703_s2, 16 }
  0x83   : > { %p492_p12 = scmp.ne.s32.totalorder %s703_s2, %s491_s7  ;;  %p497_p1 = scmp.lt.u32.totalorder %s491_s7, %s703_s2 }
  0x85   : > { %p493_p13 = pnand %p492_p12, %p436_p5 }
  0x87   : > { %p494_p0 = pneg %p493_p13 }
  0x89   : > { %p499_p2 = pnand %p497_p1, %p494_p0 }
  0x8b   : > { %502 = shalt.err (!%p499_p2)
}
  0x8c   : > { %431 = dma.vmem_to_hbm [thread:$0]  (%p436_p5), %s365_s30, 16, %s703_s2, [#allocation5]  }
  0x8d   : > { %508 = dma.done.wait (%p436_p5), [#allocation3], 16  }
  0x8e   : > { %510 = vsyncadd (%p436_p5), [#allocation3], 4294967280 }
  0x8f   : > { %512 = dma.done.wait (%p436_p5), [#allocation5], 16  }
  0x90   : > { %514 = vsyncadd (%p436_p5), [#allocation5], 4294967280 }
  0x91 PF: > { %s15_s9 = sadd.s32 1, %s517_s9  }
  0x92   : > { %p12_p3 = scmp.ge.s32.totalorder %s15_s9, 4  }
  0x94   :  { %14 = sbr.rel (!%p12_p3) target bundleno = 2 (0x2), region = 63 }
  0x9b   :  { %381 = vsyncpa [#allocation3], 1 }
  0x9c   :  { %383 = vsyncpa [#allocation3 + $0x1], 1 }
  0x9d   :  { %384 = vsyncpa [#allocation5], 1 }

</bundles_post_ra>
